<compile_context>
chip_gen: v7x
topology: tpu7x:2x2x1
jax: 0.10.0
libtpu: 0.0.40
codegen_flags: <defaults>
</compile_context>

<pallas_src>
import functools

import jax
import jax.numpy as jnp
from jax.experimental import pallas as pl
from jax.experimental.pallas import tpu as pltpu


# --------------------------------------------------------------------------- kernel

def _spatial_agg_kernel(x1_ref, x2_ref, w1a_ref, w1b_ref, b1_ref, w2_ref, b2_ref,
                        o_ref, *, pack):
    # Cast the row streams to the compute dtype on the VPU (no-op if already there).
    x1 = x1_ref[...].astype(w1a_ref.dtype)
    x2 = x2_ref[...].astype(w1b_ref.dtype)
    # Layer 1 split at the concat boundary: dot(u, W1a) + dot(u_neighb_rows, W1b).
    h = jnp.dot(x1, w1a_ref[...], preferred_element_type=jnp.float32)
    h = h + jnp.dot(x2, w1b_ref[...], preferred_element_type=jnp.float32)
    h = jnp.maximum(h + b1_ref[...], 0.0)                   # bias + ReLU in f32
    # Layer 2: cast hidden for the native MXU path, accumulate in f32, add bias.
    out = jnp.dot(h.astype(w2_ref.dtype), w2_ref[...],
                  preferred_element_type=jnp.float32)
    out = out + b2_ref[...]
    if pack > 1:
        # Lane-pack (rt, A) -> (rt/pack, pack*A == 128) so the store is lane-dense.
        rt, a = out.shape
        out = out.reshape(rt // pack, pack * a)
    o_ref[...] = out.astype(o_ref.dtype)


# -------------------------------------------------------------------- pallas wrapper

def _mlp_pallas_call(x1, x2, w1a, w1b, b1, w2, b2, *, rt, pack, weight_buffers,
                     vmem_limit_bytes):
    """Builds and runs the pallas_call.  pack==1 -> narrow (R, A) output;
    pack>1 -> lane-packed (R//pack, pack*A) output."""
    R, D = x1.shape
    Dn = x2.shape[1]
    Hp = w1a.shape[1]
    A = w2.shape[1]
    grid = (pl.cdiv(R, rt),)

    def wspec(shape):
        # Resident operands: constant index map; optionally single-buffered.
        if weight_buffers is None:
            return pl.BlockSpec(shape, lambda i: (0,) * len(shape))
        return pl.BlockSpec(shape, lambda i: (0,) * len(shape),
                            pipeline_mode=pl.Buffered(weight_buffers))

    if pack > 1:
        out_shape = jax.ShapeDtypeStruct((R // pack, pack * A), jnp.float32)
        out_spec = pl.BlockSpec((rt // pack, pack * A), lambda i: (i, 0))
    else:
        out_shape = jax.ShapeDtypeStruct((R, A), jnp.float32)
        out_spec = pl.BlockSpec((rt, A), lambda i: (i, 0))

    return pl.pallas_call(
        functools.partial(_spatial_agg_kernel, pack=pack),
        out_shape=out_shape,
        grid_spec=pltpu.PrefetchScalarGridSpec(
            num_scalar_prefetch=0,
            grid=grid,
            in_specs=[
                pl.BlockSpec((rt, D), lambda i: (i, 0)),    # u rows (read as-is)
                pl.BlockSpec((rt, Dn), lambda i: (i, 0)),   # neighbor rows (read as-is)
                wspec((D, Hp)),                             # W1a (resident)
                wspec((Dn, Hp)),                            # W1b (resident)
                wspec((1, Hp)),                             # b1
                wspec((Hp, A)),                             # W2
                wspec((1, A)),                              # b2
            ],
            out_specs=out_spec,
        ),
        compiler_params=pltpu.CompilerParams(
            dimension_semantics=("parallel",),              # megacore split on v7x
            vmem_limit_bytes=vmem_limit_bytes,
        ),
    )(x1, x2, w1a, w1b, b1, w2, b2)


# --------------------------------------------------------- one-time capability probes

def _tiny_probe(*, pack, weight_buffers):
    A = 128 // pack if pack > 1 else 8
    D = Dn = 8
    Hp = 128
    rt = 8 * pack
    R = 2 * rt                                  # two grid steps -> pipelining exercised
    f32, bf16 = jnp.float32, jnp.bfloat16
    out = _mlp_pallas_call(
        jnp.zeros((R, D), f32), jnp.zeros((R, Dn), f32),
        jnp.zeros((D, Hp), bf16), jnp.zeros((Dn, Hp), bf16), jnp.zeros((1, Hp), f32),
        jnp.zeros((Hp, A), bf16), jnp.zeros((1, A), f32),
        rt=rt, pack=pack, weight_buffers=weight_buffers, vmem_limit_bytes=32 << 20)
    jax.block_until_ready(out)


@functools.lru_cache(maxsize=None)
def _packed_store_supported(A: int) -> bool:
    """Does the in-kernel (rt, A) -> (rt/p, 128) lane-pack reshape lower here?"""
    if A > 128 or 128 % A != 0:
        return False
    try:
        _tiny_probe(pack=128 // A, weight_buffers=None)
        return True
    except Exception:
        return False                            # fall back to narrow masked stores


@functools.lru_cache(maxsize=None)
def _single_buffered_weights_supported() -> bool:
    """Does pipeline_mode=pl.Buffered(1) on constant-index operands lower here?"""
    try:
        _tiny_probe(pack=1, weight_buffers=1)
        return True
    except Exception:
        return False                            # fall back to default double buffering


# ----------------------------------------------------------------------- public entry

def spatial_aggregator(u, u_neighb, params, *, row_tile=2048,
                       compute_dtype=jnp.bfloat16, vmem_budget_bytes=24 << 20):
    """Pallas implementation of SpatialAggregator.forward with a 2-layer MLP `f`.

    Args:
        u:        (S, M, N, D)
        u_neighb: (S, M, N * n_neighb, D)
        params:   dict with 'w1' (D_in, H), 'b1' (H,), 'w2' (H, A), 'b2' (A,),
                  D_in = D * (1 + n_neighb)
        compute_dtype: bf16 (default, MXU-native) or float32 for exact parity.
    Returns:
        (S, M, N, A) in u.dtype
    """
    S, M, N, D = u.shape
    assert u_neighb.shape[2] % N == 0, "Each point must have the same number of neighbors."
    n_neighb = u_neighb.shape[2] // N
    Dn = n_neighb * D

    w1, b1, w2, b2 = params["w1"], params["b1"], params["w2"], params["b2"]
    D_in, H = w1.shape
    A = w2.shape[1]
    assert D_in == D + Dn

    # Glue: the rearrange 's m (n nb) d -> s m n (nb d)' and the flattening to rows
    # are pure row-major reshapes (no concat, no cast, no extra activation pass).
    R = S * M * N
    x1 = u.reshape(R, D)
    x2 = u_neighb.reshape(R, Dn)

    # Weights: split W1 at the concat boundary, pad H to a lane-dense multiple of 128
    # (zeros -> exact: extra hidden units are ReLU(0)=0 times zero W2 rows).
    Hp = ((H + 127) // 128) * 128
    w1a, w1b = w1[:D], w1[D:]
    if Hp != H:
        w1a = jnp.pad(w1a, ((0, 0), (0, Hp - H)))
        w1b = jnp.pad(w1b, ((0, 0), (0, Hp - H)))
        b1 = jnp.pad(b1, (0, Hp - H))
        w2 = jnp.pad(w2, ((0, Hp - H), (0, 0)))
    w1a = w1a.astype(compute_dtype)
    w1b = w1b.astype(compute_dtype)
    w2c = w2.astype(compute_dtype)
    b1_2d = b1.reshape(1, Hp).astype(jnp.float32)
    b2_2d = b2.reshape(1, A).astype(jnp.float32)

    # Output packing factor (lane-dense stores) and weight buffering, probe-guarded.
    pack = 1
    if A <= 128 and 128 % A == 0 and R % (128 // A) == 0 and _packed_store_supported(A):
        pack = 128 // A
    weight_buffers = 1 if _single_buffered_weights_supported() else None

    # Row tile: as large as the VMEM budget allows (per-step overhead ~0.35us), but
    # capped so the grid keeps >= 2 steps (v7x has 2 TensorCores per chip).
    pad128 = lambda d: ((d + 127) // 128) * 128
    itemx = jnp.dtype(x1.dtype).itemsize
    cds = jnp.dtype(compute_dtype).itemsize
    out_lane_bytes = (128 // pack) * 4                      # packed: A*4 ; narrow: 512
    per_row = (2 * (pad128(D) + pad128(Dn)) * itemx         # double-buffered x tiles
               + 2 * out_lane_bytes                         # double-buffered out tile
               + Hp * (4 + cds))                            # f32 hidden + compute-dtype copy
    rt = max(1, min(int(row_tile), vmem_budget_bytes // per_row))
    align = 8 * pack
    rt = min(rt, align * pl.cdiv(pl.cdiv(R, 2), align))     # >= 2 grid steps when possible
    rt = max(align, align * (rt // align))

    wbuf = weight_buffers if weight_buffers is not None else 2
    weight_bytes = wbuf * (((D + Dn) * Hp + Hp * A) * cds + (Hp + A) * 4)
    need = weight_bytes + per_row * rt
    vmem_limit = int(min(100 << 20, max(32 << 20, need + (8 << 20))))

    out_flat = _mlp_pallas_call(x1, x2, w1a, w1b, b1_2d, w2c, b2_2d,
                                rt=rt, pack=pack, weight_buffers=weight_buffers,
                                vmem_limit_bytes=vmem_limit)
    if pack > 1:
        out_flat = out_flat.reshape(R, A)                   # free row-major un-pack
    return out_flat.reshape(S, M, N, A).astype(u.dtype)


# -------------------------------------------------------------------------- reference

def _reference(u, u_neighb, params):
    """Plain-JAX f32 reference mirroring the PyTorch module exactly."""
    S, M, N, D = u.shape
    n_neighb = u_neighb.shape[2] // N
    u_full = jnp.concatenate((u, u_neighb.reshape(S, M, N, n_neighb * D)), axis=-1)
    h = jnp.maximum(u_full @ params["w1"] + params["b1"], 0.0)
    return h @ params["w2"] + params["b2"]


if __name__ == "__main__":
    # Small shapes consistent with the forward: (S, M, N, D), n_neighb neighbors.
    S, M, N, D = 2, 3, 16, 4
    n_neighb = 3
    hidden = 32
    agg_dim = 8
    D_in = D * (1 + n_neighb)

    key = jax.random.PRNGKey(0)
    k_u, k_un, k_w1, k_b1, k_w2, k_b2 = jax.random.split(key, 6)

    u = jax.random.normal(k_u, (S, M, N, D), dtype=jnp.float32)
    u_neighb = jax.random.normal(k_un, (S, M, N * n_neighb, D), dtype=jnp.float32)

    params = {
        "w1": jax.random.normal(k_w1, (D_in, hidden), dtype=jnp.float32) * 0.1,
        "b1": jax.random.normal(k_b1, (hidden,), dtype=jnp.float32) * 0.01,
        "w2": jax.random.normal(k_w2, (hidden, agg_dim), dtype=jnp.float32) * 0.1,
        "b2": jax.random.normal(k_b2, (agg_dim,), dtype=jnp.float32) * 0.01,
    }

    out = spatial_aggregator(u, u_neighb, params)
    out = jax.block_until_ready(out)

    ref = _reference(u, u_neighb, params)
    assert out.shape == (S, M, N, agg_dim)
    # bf16 compute path -> relaxed tolerance vs. the f32 reference.
    assert jnp.allclose(out, ref, atol=2e-2, rtol=2e-2), \
        f"max abs err {jnp.max(jnp.abs(out - ref))}"

    print("KERNEL_OK")
</pallas_src>

<mosaic_0001>
module attributes {stable_mosaic.version = 11 : i64} {
  func.func @_spatial_agg_kernel(%arg0: i32, %arg1: memref<128x8xf32, #tpu.memory_space<vmem>>, %arg2: memref<128x8xf32, #tpu.memory_space<vmem>>, %arg3: memref<8x128xbf16, #tpu.memory_space<vmem>>, %arg4: memref<8x128xbf16, #tpu.memory_space<vmem>>, %arg5: memref<1x128xf32, #tpu.memory_space<vmem>>, %arg6: memref<128x8xbf16, #tpu.memory_space<vmem>>, %arg7: memref<1x8xf32, #tpu.memory_space<vmem>>, %arg8: memref<8x128xf32, #tpu.memory_space<vmem>>) attributes {dimension_semantics = [#tpu.dimension_semantics<parallel>], iteration_bounds = array<i64: 2>, scalar_prefetch = 0 : i64, scratch_operands = 0 : i64, tpu.core_type = #tpu.core_type<tc>, window_params = [{transform_indices = @transform_0, window_bounds = array<i64: 128, 8>}, {transform_indices = @transform_1, window_bounds = array<i64: 128, 8>}, {pipeline_mode = #tpu.pipeline_mode<synchronous>, transform_indices = @transform_2, window_bounds = array<i64: 8, 128>}, {pipeline_mode = #tpu.pipeline_mode<synchronous>, transform_indices = @transform_3, window_bounds = array<i64: 8, 128>}, {pipeline_mode = #tpu.pipeline_mode<synchronous>, transform_indices = @transform_4, window_bounds = array<i64: 1, 128>}, {pipeline_mode = #tpu.pipeline_mode<synchronous>, transform_indices = @transform_5, window_bounds = array<i64: 128, 8>}, {pipeline_mode = #tpu.pipeline_mode<synchronous>, transform_indices = @transform_6, window_bounds = array<i64: 1, 8>}, {transform_indices = @transform_7, window_bounds = array<i64: 8, 128>}]} {
    %c0 = arith.constant 0 : index
    %c0_0 = arith.constant 0 : index
    %0 = vector.load %arg1[%c0, %c0_0] : memref<128x8xf32, #tpu.memory_space<vmem>>, vector<128x8xf32>
    %1 = arith.truncf %0 : vector<128x8xf32> to vector<128x8xbf16>
    %c0_1 = arith.constant 0 : index
    %c0_2 = arith.constant 0 : index
    %2 = vector.load %arg2[%c0_1, %c0_2] : memref<128x8xf32, #tpu.memory_space<vmem>>, vector<128x8xf32>
    %3 = arith.truncf %2 : vector<128x8xf32> to vector<128x8xbf16>
    %c0_3 = arith.constant 0 : index
    %c0_4 = arith.constant 0 : index
    %4 = vector.load %arg3[%c0_3, %c0_4] : memref<8x128xbf16, #tpu.memory_space<vmem>>, vector<8x128xbf16>
    %cst = arith.constant dense<0.000000e+00> : vector<128x128xf32>
    %5 = tpu.matmul %1, %4, %cst {dimension_numbers = #tpu.dot_dimension_numbers<[1], [0], [0], [1], [0, 0, 1, 1], [], []>} : vector<128x8xbf16>, vector<8x128xbf16>, vector<128x128xf32> -> vector<128x128xf32>
    %c0_5 = arith.constant 0 : index
    %c0_6 = arith.constant 0 : index
    %6 = vector.load %arg4[%c0_5, %c0_6] : memref<8x128xbf16, #tpu.memory_space<vmem>>, vector<8x128xbf16>
    %cst_7 = arith.constant dense<0.000000e+00> : vector<128x128xf32>
    %7 = tpu.matmul %3, %6, %cst_7 {dimension_numbers = #tpu.dot_dimension_numbers<[1], [0], [0], [1], [0, 0, 1, 1], [], []>} : vector<128x8xbf16>, vector<8x128xbf16>, vector<128x128xf32> -> vector<128x128xf32>
    %8 = arith.addf %5, %7 : vector<128x128xf32>
    %c0_8 = arith.constant 0 : index
    %c0_9 = arith.constant 0 : index
    %9 = vector.load %arg5[%c0_8, %c0_9] : memref<1x128xf32, #tpu.memory_space<vmem>>, vector<1x128xf32>
    %10 = vector.broadcast %9 : vector<1x128xf32> to vector<128x128xf32>
    %11 = arith.addf %8, %10 : vector<128x128xf32>
    %cst_10 = arith.constant 0.000000e+00 : f32
    %12 = vector.broadcast %cst_10 : f32 to vector<128x128xf32>
    %13 = arith.maximumf %11, %12 : vector<128x128xf32>
    %14 = arith.truncf %13 : vector<128x128xf32> to vector<128x128xbf16>
    %c0_11 = arith.constant 0 : index
    %c0_12 = arith.constant 0 : index
    %15 = vector.load %arg6[%c0_11, %c0_12] : memref<128x8xbf16, #tpu.memory_space<vmem>>, vector<128x8xbf16>
    %cst_13 = arith.constant dense<0.000000e+00> : vector<128x8xf32>
    %16 = tpu.matmul %14, %15, %cst_13 {dimension_numbers = #tpu.dot_dimension_numbers<[1], [0], [0], [1], [0, 0, 1, 1], [], []>} : vector<128x128xbf16>, vector<128x8xbf16>, vector<128x8xf32> -> vector<128x8xf32>
    %c0_14 = arith.constant 0 : index
    %c0_15 = arith.constant 0 : index
    %17 = vector.load %arg7[%c0_14, %c0_15] : memref<1x8xf32, #tpu.memory_space<vmem>>, vector<1x8xf32>
    %18 = vector.broadcast %17 : vector<1x8xf32> to vector<128x8xf32>
    %19 = arith.addf %16, %18 : vector<128x8xf32>
    %20 = vector.shape_cast %19 : vector<128x8xf32> to vector<8x128xf32>
    %c0_16 = arith.constant 0 : index
    %c0_17 = arith.constant 0 : index
    %21 = vector.load %arg8[%c0_16, %c0_17] : memref<8x128xf32, #tpu.memory_space<vmem>>, vector<8x128xf32>
    tpu.vector_store %arg8[%c0_16, %c0_17], %20 {strides = array<i32>} : memref<8x128xf32, #tpu.memory_space<vmem>>, vector<8x128xf32>,
    return
  }
  func.func @transform_0(%arg0: i32) -> (i32, i32) {
    %c0_i32 = arith.constant 0 : i32
    %c0_i32_0 = arith.constant 0 : i32
    return %arg0, %c0_i32 : i32, i32
  }
  func.func @transform_1(%arg0: i32) -> (i32, i32) {
    %c0_i32 = arith.constant 0 : i32
    %c0_i32_0 = arith.constant 0 : i32
    return %arg0, %c0_i32 : i32, i32
  }
  func.func @transform_2(%arg0: i32) -> (i32, i32) {
    %c0_i32 = arith.constant 0 : i32
    %c0_i32_0 = arith.constant 0 : i32
    %c0_i32_1 = arith.constant 0 : i32
    return %c0_i32, %c0_i32_0 : i32, i32
  }
  func.func @transform_3(%arg0: i32) -> (i32, i32) {
    %c0_i32 = arith.constant 0 : i32
    %c0_i32_0 = arith.constant 0 : i32
    %c0_i32_1 = arith.constant 0 : i32
    return %c0_i32, %c0_i32_0 : i32, i32
  }
  func.func @transform_4(%arg0: i32) -> (i32, i32) {
    %c0_i32 = arith.constant 0 : i32
    %c0_i32_0 = arith.constant 0 : i32
    %c0_i32_1 = arith.constant 0 : i32
    return %c0_i32, %c0_i32_0 : i32, i32
  }
  func.func @transform_5(%arg0: i32) -> (i32, i32) {
    %c0_i32 = arith.constant 0 : i32
    %c0_i32_0 = arith.constant 0 : i32
    %c0_i32_1 = arith.constant 0 : i32
    return %c0_i32, %c0_i32_0 : i32, i32
  }
  func.func @transform_6(%arg0: i32) -> (i32, i32) {
    %c0_i32 = arith.constant 0 : i32
    %c0_i32_0 = arith.constant 0 : i32
    %c0_i32_1 = arith.constant 0 : i32
    return %c0_i32, %c0_i32_0 : i32, i32
  }
  func.func @transform_7(%arg0: i32) -> (i32, i32) {
    %c0_i32 = arith.constant 0 : i32
    %c0_i32_0 = arith.constant 0 : i32
    return %arg0, %c0_i32 : i32, i32
  }
}

module attributes {stable_mosaic.version = 11 : i64} {
  func.func @_spatial_agg_kernel(%arg0: i32, %arg1: memref<8x8xf32, #tpu.memory_space<vmem>>, %arg2: memref<8x8xf32, #tpu.memory_space<vmem>>, %arg3: memref<8x128xbf16, #tpu.memory_space<vmem>>, %arg4: memref<8x128xbf16, #tpu.memory_space<vmem>>, %arg5: memref<1x128xf32, #tpu.memory_space<vmem>>, %arg6: memref<128x8xbf16, #tpu.memory_space<vmem>>, %arg7: memref<1x8xf32, #tpu.memory_space<vmem>>, %arg8: memref<8x8xf32, #tpu.memory_space<vmem>>) attributes {dimension_semantics = [#tpu.dimension_semantics<parallel>], iteration_bounds = array<i64: 2>, scalar_prefetch = 0 : i64, scratch_operands = 0 : i64, tpu.core_type = #tpu.core_type<tc>, window_params = [{transform_indices = @transform_0, window_bounds = array<i64: 8, 8>}, {transform_indices = @transform_1, window_bounds = array<i64: 8, 8>}, {pipeline_mode = #tpu.pipeline_mode<synchronous>, transform_indices = @transform_2, window_bounds = array<i64: 8, 128>}, {pipeline_mode = #tpu.pipeline_mode<synchronous>, transform_indices = @transform_3, window_bounds = array<i64: 8, 128>}, {pipeline_mode = #tpu.pipeline_mode<synchronous>, transform_indices = @transform_4, window_bounds = array<i64: 1, 128>}, {pipeline_mode = #tpu.pipeline_mode<synchronous>, transform_indices = @transform_5, window_bounds = array<i64: 128, 8>}, {pipeline_mode = #tpu.pipeline_mode<synchronous>, transform_indices = @transform_6, window_bounds = array<i64: 1, 8>}, {transform_indices = @transform_7, window_bounds = array<i64: 8, 8>}]} {
    %c0 = arith.constant 0 : index
    %c0_0 = arith.constant 0 : index
    %0 = vector.load %arg1[%c0, %c0_0] : memref<8x8xf32, #tpu.memory_space<vmem>>, vector<8x8xf32>
    %1 = arith.truncf %0 : vector<8x8xf32> to vector<8x8xbf16>
    %c0_1 = arith.constant 0 : index
    %c0_2 = arith.constant 0 : index
    %2 = vector.load %arg2[%c0_1, %c0_2] : memref<8x8xf32, #tpu.memory_space<vmem>>, vector<8x8xf32>
    %3 = arith.truncf %2 : vector<8x8xf32> to vector<8x8xbf16>
    %c0_3 = arith.constant 0 : index
    %c0_4 = arith.constant 0 : index
    %4 = vector.load %arg3[%c0_3, %c0_4] : memref<8x128xbf16, #tpu.memory_space<vmem>>, vector<8x128xbf16>
    %cst = arith.constant dense<0.000000e+00> : vector<8x128xf32>
    %5 = tpu.matmul %1, %4, %cst {dimension_numbers = #tpu.dot_dimension_numbers<[1], [0], [0], [1], [0, 0, 1, 1], [], []>} : vector<8x8xbf16>, vector<8x128xbf16>, vector<8x128xf32> -> vector<8x128xf32>
    %c0_5 = arith.constant 0 : index
    %c0_6 = arith.constant 0 : index
    %6 = vector.load %arg4[%c0_5, %c0_6] : memref<8x128xbf16, #tpu.memory_space<vmem>>, vector<8x128xbf16>
    %cst_7 = arith.constant dense<0.000000e+00> : vector<8x128xf32>
    %7 = tpu.matmul %3, %6, %cst_7 {dimension_numbers = #tpu.dot_dimension_numbers<[1], [0], [0], [1], [0, 0, 1, 1], [], []>} : vector<8x8xbf16>, vector<8x128xbf16>, vector<8x128xf32> -> vector<8x128xf32>
    %8 = arith.addf %5, %7 : vector<8x128xf32>
    %c0_8 = arith.constant 0 : index
    %c0_9 = arith.constant 0 : index
    %9 = vector.load %arg5[%c0_8, %c0_9] : memref<1x128xf32, #tpu.memory_space<vmem>>, vector<1x128xf32>
    %10 = vector.broadcast %9 : vector<1x128xf32> to vector<8x128xf32>
    %11 = arith.addf %8, %10 : vector<8x128xf32>
    %cst_10 = arith.constant 0.000000e+00 : f32
    %12 = vector.broadcast %cst_10 : f32 to vector<8x128xf32>
    %13 = arith.maximumf %11, %12 : vector<8x128xf32>
    %14 = arith.truncf %13 : vector<8x128xf32> to vector<8x128xbf16>
    %c0_11 = arith.constant 0 : index
    %c0_12 = arith.constant 0 : index
    %15 = vector.load %arg6[%c0_11, %c0_12] : memref<128x8xbf16, #tpu.memory_space<vmem>>, vector<128x8xbf16>
    %cst_13 = arith.constant dense<0.000000e+00> : vector<8x8xf32>
    %16 = tpu.matmul %14, %15, %cst_13 {dimension_numbers = #tpu.dot_dimension_numbers<[1], [0], [0], [1], [0, 0, 1, 1], [], []>} : vector<8x128xbf16>, vector<128x8xbf16>, vector<8x8xf32> -> vector<8x8xf32>
    %c0_14 = arith.constant 0 : index
    %c0_15 = arith.constant 0 : index
    %17 = vector.load %arg7[%c0_14, %c0_15] : memref<1x8xf32, #tpu.memory_space<vmem>>, vector<1x8xf32>
    %18 = vector.broadcast %17 : vector<1x8xf32> to vector<8x8xf32>
    %19 = arith.addf %16, %18 : vector<8x8xf32>
    %c0_16 = arith.constant 0 : index
    %c0_17 = arith.constant 0 : index
    %20 = vector.load %arg8[%c0_16, %c0_17] : memref<8x8xf32, #tpu.memory_space<vmem>>, vector<8x8xf32>
    tpu.vector_store %arg8[%c0_16, %c0_17], %19 {strides = array<i32>} : memref<8x8xf32, #tpu.memory_space<vmem>>, vector<8x8xf32>,
    return
  }
  func.func @transform_0(%arg0: i32) -> (i32, i32) {
    %c0_i32 = arith.constant 0 : i32
    %c0_i32_0 = arith.constant 0 : i32
    return %arg0, %c0_i32 : i32, i32
  }
  func.func @transform_1(%arg0: i32) -> (i32, i32) {
    %c0_i32 = arith.constant 0 : i32
    %c0_i32_0 = arith.constant 0 : i32
    return %arg0, %c0_i32 : i32, i32
  }
  func.func @transform_2(%arg0: i32) -> (i32, i32) {
    %c0_i32 = arith.constant 0 : i32
    %c0_i32_0 = arith.constant 0 : i32
    %c0_i32_1 = arith.constant 0 : i32
    return %c0_i32, %c0_i32_0 : i32, i32
  }
  func.func @transform_3(%arg0: i32) -> (i32, i32) {
    %c0_i32 = arith.constant 0 : i32
    %c0_i32_0 = arith.constant 0 : i32
    %c0_i32_1 = arith.constant 0 : i32
    return %c0_i32, %c0_i32_0 : i32, i32
  }
  func.func @transform_4(%arg0: i32) -> (i32, i32) {
    %c0_i32 = arith.constant 0 : i32
    %c0_i32_0 = arith.constant 0 : i32
    %c0_i32_1 = arith.constant 0 : i32
    return %c0_i32, %c0_i32_0 : i32, i32
  }
  func.func @transform_5(%arg0: i32) -> (i32, i32) {
    %c0_i32 = arith.constant 0 : i32
    %c0_i32_0 = arith.constant 0 : i32
    %c0_i32_1 = arith.constant 0 : i32
    return %c0_i32, %c0_i32_0 : i32, i32
  }
  func.func @transform_6(%arg0: i32) -> (i32, i32) {
    %c0_i32 = arith.constant 0 : i32
    %c0_i32_0 = arith.constant 0 : i32
    %c0_i32_1 = arith.constant 0 : i32
    return %c0_i32, %c0_i32_0 : i32, i32
  }
  func.func @transform_7(%arg0: i32) -> (i32, i32) {
    %c0_i32 = arith.constant 0 : i32
    %c0_i32_0 = arith.constant 0 : i32
    return %arg0, %c0_i32 : i32, i32
  }
}

module attributes {stable_mosaic.version = 11 : i64} {
  func.func @_spatial_agg_kernel(%arg0: i32, %arg1: memref<48x4xf32, #tpu.memory_space<vmem>>, %arg2: memref<48x12xf32, #tpu.memory_space<vmem>>, %arg3: memref<4x128xbf16, #tpu.memory_space<vmem>>, %arg4: memref<12x128xbf16, #tpu.memory_space<vmem>>, %arg5: memref<1x128xf32, #tpu.memory_space<vmem>>, %arg6: memref<128x8xbf16, #tpu.memory_space<vmem>>, %arg7: memref<1x8xf32, #tpu.memory_space<vmem>>, %arg8: memref<48x8xf32, #tpu.memory_space<vmem>>) attributes {dimension_semantics = [#tpu.dimension_semantics<parallel>], iteration_bounds = array<i64: 2>, scalar_prefetch = 0 : i64, scratch_operands = 0 : i64, tpu.core_type = #tpu.core_type<tc>, window_params = [{transform_indices = @transform_0, window_bounds = array<i64: 48, 4>}, {transform_indices = @transform_1, window_bounds = array<i64: 48, 12>}, {pipeline_mode = #tpu.pipeline_mode<synchronous>, transform_indices = @transform_2, window_bounds = array<i64: 4, 128>}, {pipeline_mode = #tpu.pipeline_mode<synchronous>, transform_indices = @transform_3, window_bounds = array<i64: 12, 128>}, {pipeline_mode = #tpu.pipeline_mode<synchronous>, transform_indices = @transform_4, window_bounds = array<i64: 1, 128>}, {pipeline_mode = #tpu.pipeline_mode<synchronous>, transform_indices = @transform_5, window_bounds = array<i64: 128, 8>}, {pipeline_mode = #tpu.pipeline_mode<synchronous>, transform_indices = @transform_6, window_bounds = array<i64: 1, 8>}, {transform_indices = @transform_7, window_bounds = array<i64: 48, 8>}]} {
    %c0 = arith.constant 0 : index
    %c0_0 = arith.constant 0 : index
    %0 = vector.load %arg1[%c0, %c0_0] : memref<48x4xf32, #tpu.memory_space<vmem>>, vector<48x4xf32>
    %1 = arith.truncf %0 : vector<48x4xf32> to vector<48x4xbf16>
    %c0_1 = arith.constant 0 : index
    %c0_2 = arith.constant 0 : index
    %2 = vector.load %arg2[%c0_1, %c0_2] : memref<48x12xf32, #tpu.memory_space<vmem>>, vector<48x12xf32>
    %3 = arith.truncf %2 : vector<48x12xf32> to vector<48x12xbf16>
    %c0_3 = arith.constant 0 : index
    %c0_4 = arith.constant 0 : index
    %4 = vector.load %arg3[%c0_3, %c0_4] : memref<4x128xbf16, #tpu.memory_space<vmem>>, vector<4x128xbf16>
    %cst = arith.constant dense<0.000000e+00> : vector<48x128xf32>
    %5 = tpu.matmul %1, %4, %cst {dimension_numbers = #tpu.dot_dimension_numbers<[1], [0], [0], [1], [0, 0, 1, 1], [], []>} : vector<48x4xbf16>, vector<4x128xbf16>, vector<48x128xf32> -> vector<48x128xf32>
    %c0_5 = arith.constant 0 : index
    %c0_6 = arith.constant 0 : index
    %6 = vector.load %arg4[%c0_5, %c0_6] : memref<12x128xbf16, #tpu.memory_space<vmem>>, vector<12x128xbf16>
    %cst_7 = arith.constant dense<0.000000e+00> : vector<48x128xf32>
    %7 = tpu.matmul %3, %6, %cst_7 {dimension_numbers = #tpu.dot_dimension_numbers<[1], [0], [0], [1], [0, 0, 1, 1], [], []>} : vector<48x12xbf16>, vector<12x128xbf16>, vector<48x128xf32> -> vector<48x128xf32>
    %8 = arith.addf %5, %7 : vector<48x128xf32>
    %c0_8 = arith.constant 0 : index
    %c0_9 = arith.constant 0 : index
    %9 = vector.load %arg5[%c0_8, %c0_9] : memref<1x128xf32, #tpu.memory_space<vmem>>, vector<1x128xf32>
    %10 = vector.broadcast %9 : vector<1x128xf32> to vector<48x128xf32>
    %11 = arith.addf %8, %10 : vector<48x128xf32>
    %cst_10 = arith.constant 0.000000e+00 : f32
    %12 = vector.broadcast %cst_10 : f32 to vector<48x128xf32>
    %13 = arith.maximumf %11, %12 : vector<48x128xf32>
    %14 = arith.truncf %13 : vector<48x128xf32> to vector<48x128xbf16>
    %c0_11 = arith.constant 0 : index
    %c0_12 = arith.constant 0 : index
    %15 = vector.load %arg6[%c0_11, %c0_12] : memref<128x8xbf16, #tpu.memory_space<vmem>>, vector<128x8xbf16>
    %cst_13 = arith.constant dense<0.000000e+00> : vector<48x8xf32>
    %16 = tpu.matmul %14, %15, %cst_13 {dimension_numbers = #tpu.dot_dimension_numbers<[1], [0], [0], [1], [0, 0, 1, 1], [], []>} : vector<48x128xbf16>, vector<128x8xbf16>, vector<48x8xf32> -> vector<48x8xf32>
    %c0_14 = arith.constant 0 : index
    %c0_15 = arith.constant 0 : index
    %17 = vector.load %arg7[%c0_14, %c0_15] : memref<1x8xf32, #tpu.memory_space<vmem>>, vector<1x8xf32>
    %18 = vector.broadcast %17 : vector<1x8xf32> to vector<48x8xf32>
    %19 = arith.addf %16, %18 : vector<48x8xf32>
    %c0_16 = arith.constant 0 : index
    %c0_17 = arith.constant 0 : index
    %20 = vector.load %arg8[%c0_16, %c0_17] : memref<48x8xf32, #tpu.memory_space<vmem>>, vector<48x8xf32>
    tpu.vector_store %arg8[%c0_16, %c0_17], %19 {strides = array<i32>} : memref<48x8xf32, #tpu.memory_space<vmem>>, vector<48x8xf32>,
    return
  }
  func.func @transform_0(%arg0: i32) -> (i32, i32) {
    %c0_i32 = arith.constant 0 : i32
    %c0_i32_0 = arith.constant 0 : i32
    return %arg0, %c0_i32 : i32, i32
  }
  func.func @transform_1(%arg0: i32) -> (i32, i32) {
    %c0_i32 = arith.constant 0 : i32
    %c0_i32_0 = arith.constant 0 : i32
    return %arg0, %c0_i32 : i32, i32
  }
  func.func @transform_2(%arg0: i32) -> (i32, i32) {
    %c0_i32 = arith.constant 0 : i32
    %c0_i32_0 = arith.constant 0 : i32
    %c0_i32_1 = arith.constant 0 : i32
    return %c0_i32, %c0_i32_0 : i32, i32
  }
  func.func @transform_3(%arg0: i32) -> (i32, i32) {
    %c0_i32 = arith.constant 0 : i32
    %c0_i32_0 = arith.constant 0 : i32
    %c0_i32_1 = arith.constant 0 : i32
    return %c0_i32, %c0_i32_0 : i32, i32
  }
  func.func @transform_4(%arg0: i32) -> (i32, i32) {
    %c0_i32 = arith.constant 0 : i32
    %c0_i32_0 = arith.constant 0 : i32
    %c0_i32_1 = arith.constant 0 : i32
    return %c0_i32, %c0_i32_0 : i32, i32
  }
  func.func @transform_5(%arg0: i32) -> (i32, i32) {
    %c0_i32 = arith.constant 0 : i32
    %c0_i32_0 = arith.constant 0 : i32
    %c0_i32_1 = arith.constant 0 : i32
    return %c0_i32, %c0_i32_0 : i32, i32
  }
  func.func @transform_6(%arg0: i32) -> (i32, i32) {
    %c0_i32 = arith.constant 0 : i32
    %c0_i32_0 = arith.constant 0 : i32
    %c0_i32_1 = arith.constant 0 : i32
    return %c0_i32, %c0_i32_0 : i32, i32
  }
  func.func @transform_7(%arg0: i32) -> (i32, i32) {
    %c0_i32 = arith.constant 0 : i32
    %c0_i32_0 = arith.constant 0 : i32
    return %arg0, %c0_i32 : i32, i32
  }
}

</mosaic_0001>

<bundles_post_ra>
// kernel: tpu_custom_call.1
= control target key start
LH: loop header
LB: loop body
LE: loop exit
PB: predicated region body
PF: predicated region fallthrough
CT: control target
= control target key end

     0   :  { %s714_s24 = smov 0   ;;  %s783_s0 = inlined_call_operand.vmem [shape: f32[16,8], index: 0, kind: input, shape index: {}]   ;;  %s784_s1 = inlined_call_operand.vmem [shape: f32[16,8], index: 1, kind: input, shape index: {}]   ;;  %s785_s2 = inlined_call_operand.vmem [shape: bf16[8,128], index: 2, kind: input, shape index: {}]   ;;  %s786_s3 = inlined_call_operand.vmem [shape: bf16[8,128], index: 3, kind: input, shape index: {}]   ;;  %s787_s4 = inlined_call_operand.vmem [shape: f32[1,128], index: 4, kind: input, shape index: {}]   ;;  %s788_s5 = inlined_call_operand.vmem [shape: bf16[128,8], index: 5, kind: input, shape index: {}]   ;;  %s789_s6 = inlined_call_operand.vmem [shape: f32[1,8], index: 6, kind: input, shape index: {}]   ;;  %s790_s7 = inlined_call_operand.vmem [shape: f32[16,8], index: 7, kind: output, shape index: {}]  }
   0x1 LB: > { %s579_s25 = sadd.s32 4294967295, %s670_s24   ;;  %p583_p0 = scmp.ge.s32.totalorder %s670_s24, 1  ;;  %s670_s24 = sphi %s714_s24, %s17_s24  }
   0x2   : > { %p245_p1 = scmp.lt.s32.totalorder %s670_s24, 3 }
   0x4   : > { %p246_p2 = pnand %p583_p0, %p245_p1 }
   0x5   : > { %v297_v0 = vld [vmem:[%s786_s3] sm:$0xf] (!%p246_p2)  ;;  %vm302_vm0 = vcmask (!%p246_p2), 1043456   ;;  %v672_v1 = vmov (!%p246_p2), 0.0   ;;  %p279_p3 = scmp.lt.s32.totalorder (!%p246_p2), %s579_s25, 1  ;;  %vm673_vm1 = vmmov (!%p246_p2), 0  }
   0x6   : > { %249 = sbr.rel (%p246_p2) target bundleno = 462 (0x1ce), region = 48  ;;  %614 = vmatprep.subr.bf16.mxu1 (!%p246_p2), %v672_v1  ;;  %v304_v2 = vsel (!%p246_p2), %vm302_vm0, %v297_v0, 0  ;;  %626 = vmatprep.subr.bf16.mxu0 (!%p246_p2), %v672_v1  ;;  %v656_v3 = vld [vmem:[%s788_s5] sm:$0xff] (!%p246_p2)   ;;  %v657_v4 = vld [vmem:[%s788_s5 + $0x8] sm:$0xff] (!%p246_p2)   ;;  %vm298_vm2 = vcmask (!%p246_p2), 64512   ;;  %v658_v8 = vld [vmem:[%s788_s5 + $0x10] sm:$0xff] (!%p246_p2)  }
   0x7   : > { %615 = vmatpush3.bf16.msra.mxu1 (!%p246_p2), %v304_v2  ;;  %616 = vmatprep.mubr.msk.bf16.mxu1 (!%p246_p2), %vm673_vm1, %v672_v1  ;;  %v296_v5 = vld [vmem:[%s785_s2] sm:$0xf] (!%p246_p2)  ;;  %v659_v11 = vld [vmem:[%s788_s5 + $0x18] sm:$0xff] (!%p246_p2)   ;;  %v661_v14 = vld [vmem:[%s788_s5 + $0x28] sm:$0xff] (!%p246_p2)  }
   0x8   : > { %620 = vmatprep.subr.bf16.mxu1 (!%p246_p2), %v672_v1  ;;  %627 = vmatpush3.bf16.msra.mxu0 (!%p246_p2), %v656_v3  ;;  %v350_v6 = vsel (!%p246_p2), %vm302_vm0, %v296_v5, 0  ;;  %v660_v13 = vld [vmem:[%s788_s5 + $0x20] sm:$0xff] (!%p246_p2)   ;;  %v662_v15 = vld [vmem:[%s788_s5 + $0x30] sm:$0xff] (!%p246_p2)   ;;  %v663_v16 = vld [vmem:[%s788_s5 + $0x38] sm:$0xff] (!%p246_p2)  }
   0x9   : > { %628 = vmatprep.subr.bf16.mxu0 (!%p246_p2), %v672_v1  ;;  %642 = vmatprep.mubr.msk.bf16.mxu0 (!%p246_p2), %vm673_vm1, %v672_v1  ;;  %v589_v22 = vld [vmem:[%s787_s4] ss:$0 sm:$0xff] (!%p246_p2) }
   0xa   : > { %v590_v30 = vld [vmem:[%s789_s6] ss:$0 sm:$0xff] (!%p246_p2) }
   0xc   : > { %629 = vmatpush3.bf16.msra.mxu0 (!%p246_p2), %v657_v4 }
   0xd   : > { %s792_s25 = smov (!%p279_p3, %s579_s25), 1  ;;  %630 = vmatprep.subr.bf16.mxu0 %v672_v1 }
   0xe   : > { %s737_s11 = sshll.u32 %s792_s25, 3 }
   0xf   : > { %s286_s14 = scalar_lea.vmem %s784_s1, %s737_s11  ;;  %s282_s19 = scalar_lea.vmem %s783_s0, %s737_s11 }
  0x10   : > { %v294_v7 = vld [vmem:[%s286_s14] sm:$0xff]  ;;  %631 = vmatpush3.bf16.msra.mxu0 %v658_v8  ;;  %s290_s15 = scalar_lea.vmem %s790_s7, %s737_s11 }
  0x11   : > { %v295_v9 = vpack.c.bf16 %v294_v7, %v294_v7  ;;  %v292_v10 = vld [vmem:[%s282_s19] sm:$0xff]  ;;  %632 = vmatprep.subr.bf16.mxu0 %v672_v1 }
  0x12   : > { %v293_v12 = vpack.c.bf16 %v292_v10, %v292_v10 }
  0x13   : > { %617 = vmatmul.mubr.msk.bf16.vlgmr.msra.gmra.mrb[0].mxu1 %vm298_vm2, %v295_v9 }
  0x14   : > { %621 = vmatpush3.bf16.msra.mxu1 %v350_v6  ;;  %622 = vmatprep.mubr.msk.bf16.mxu1 %vm673_vm1, %v672_v1 }
  0x15   : > { %633 = vmatpush3.bf16.msra.mxu0 %v659_v11 }
  0x16   : > { %634 = vmatprep.subr.bf16.mxu0 %v672_v1 }
  0x19   : > { %635 = vmatpush3.bf16.msra.mxu0 %v660_v13 }
  0x1a   : > { %636 = vmatprep.subr.bf16.mxu0 %v672_v1 }
  0x1b   : > { %623 = vmatmul.mubr.msk.bf16.vlgmr.msra.gmra.mrb[4].mxu1 %vm298_vm2, %v293_v12 }
  0x1d   : > { %637 = vmatpush3.bf16.msra.mxu0 %v661_v14 }
  0x1e   : > { %638 = vmatprep.subr.bf16.mxu0 %v672_v1 }
  0x21   : > { %639 = vmatpush3.bf16.msra.mxu0 %v662_v15 }
  0x22   : > { %640 = vmatprep.subr.bf16.mxu0 %v672_v1 }
  0x25   : > { %641 = vmatpush3.bf16.msra.mxu0 %v663_v16 }
  0xe6   : > { %v340_v17 = vpop.f32.mrb[0].mxu1 }
  0xe7   : > { %v618_v18 = vpop.f32.mrb[1].mxu1 }
  0xe8   : > { %v343_v19 = vpop.f32.mrb[2].mxu1 }
  0xe9   : > { %v619_v20 = vpop.f32.mrb[3].mxu1 }
  0xee   : > { %v386_v21 = vpop.f32.mrb[4].mxu1 }
  0xef   : > { %v387_v23 = vadd.f32 %v386_v21, %v340_v17  ;;  %v624_v24 = vpop.f32.mrb[5].mxu1 }
  0xf0   : > { %v389_v25 = vpop.f32.mrb[6].mxu1 }
  0xf1   : > { %v399_v26 = vadd.f32 %v589_v22, %v387_v23  ;;  %v625_v27 = vpop.f32.mrb[7].mxu1 }
  0xf3   : > { %v400_v28 = vmax.f32 %v399_v26, 0.0 }
  0xf5   : > { %v401_v29 = vpack.c.bf16 %v400_v28, %v400_v28 }
  0xf7   : > { %643 = vmatmul.mubr.bf16.vlgmr.msra.gmra.mrb[0].mxu0 %v401_v29 }
 0x1ca   : > { %v507_v31 = vpop.f32.mrb[0].mxu0 }
 0x1cb   : > { %v508_v32 = vadd.f32 %v590_v30, %v507_v31  ;;  %v644_v33 = vpop.f32.mrb[1].mxu0 }
 0x1cc   : > { %v510_v34 = vpop.f32.mrb[2].mxu0 }
 0x1cd   : > { %513 = vst.msk [vmem:[%s290_s15] sm:$0xff] %vm298_vm2, %v508_v32  ;;  %v645_v35 = vpop.f32.mrb[3].mxu0 }
 0x1ce PF: > { %s17_s24 = sadd.s32 1, %s670_s24  }
 0x1cf   : > { %p14_p4 = scmp.ge.s32.totalorder %s17_s24, 4  }
 0x1d1   :  { %16 = sbr.rel (!%p14_p4) target bundleno = 1 (0x1), region = 81 }

// kernel: tpu_custom_call.1
= control target key start
LH: loop header
LB: loop body
LE: loop exit
PB: predicated region body
PF: predicated region fallthrough
CT: control target
= control target key end

     0   :  { %s885_s24 = smov 0   ;;  %s1010_s0 = inlined_call_operand.vmem [shape: f32[96,4], index: 0, kind: input, shape index: {}]   ;;  %s1011_s1 = inlined_call_operand.vmem [shape: f32[96,12], index: 1, kind: input, shape index: {}]   ;;  %s1012_s2 = inlined_call_operand.vmem [shape: bf16[4,128], index: 2, kind: input, shape index: {}]   ;;  %s1013_s3 = inlined_call_operand.vmem [shape: bf16[12,128], index: 3, kind: input, shape index: {}]   ;;  %s1014_s4 = inlined_call_operand.vmem [shape: f32[1,128], index: 4, kind: input, shape index: {}]   ;;  %s1015_s5 = inlined_call_operand.vmem [shape: bf16[128,8], index: 5, kind: input, shape index: {}]   ;;  %s1016_s6 = inlined_call_operand.vmem [shape: f32[1,8], index: 6, kind: input, shape index: {}]   ;;  %s1017_s7 = inlined_call_operand.vmem [shape: f32[96,8], index: 7, kind: output, shape index: {}]  }
   0x1 LB: > { %s698_s25 = sadd.s32 4294967295, %s841_s24   ;;  %p702_p0 = scmp.ge.s32.totalorder %s841_s24, 1  ;;  %s841_s24 = sphi %s885_s24, %s17_s24  }
   0x2   : > { %p249_p1 = scmp.lt.s32.totalorder %s841_s24, 3 }
   0x4   : > { %p250_p2 = pnand %p702_p0, %p249_p1 }
   0x5   : > { %vm341_vm0 = vcmask (!%p250_p2), 1045504   ;;  %v843_v0 = vmov (!%p250_p2), 0.0   ;;  %v826_v1 = vld [vmem:[%s1013_s3] sm:$0x3f] (!%p250_p2)   ;;  %vm412_vm1 = vcmask (!%p250_p2), 1041408   ;;  %vm844_vm2 = vmmov (!%p250_p2), 0  }
   0x6   : > { %253 = sbr.rel (%p250_p2) target bundleno = 475 (0x1db), region = 48  ;;  %744 = vmatprep.subr.bf16.mxu0 (!%p250_p2), %v843_v0  ;;  %758 = vmatprep.subr.bf16.mxu1 (!%p250_p2), %v843_v0  ;;  %v323_v2 = vld [vmem:[%s1012_s2] sm:$0x3] (!%p250_p2)  ;;  %v343_v4 = vsel (!%p250_p2), %vm341_vm0, %v826_v1, 0  ;;  %vm331_vm3 = vcmask (!%p250_p2), 97280   ;;  %vm402_vm4 = vcmask (!%p250_p2), 31744  }
   0x7   : > { %v414_v3 = vsel (!%p250_p2), %vm412_vm1, %v323_v2, 0  ;;  %746 = vmatprep.mubr.msk.bf16.mxu0 (!%p250_p2), %vm844_vm2, %v843_v0  ;;  %760 = vmatprep.mubr.msk.bf16.mxu1 (!%p250_p2), %vm844_vm2, %v843_v0  ;;  %s286_s30 = smul.u32 (!%p250_p2), 6, %s698_s25  ;;  %v827_v10 = vld [vmem:[%s1015_s5] sm:$0xff] (!%p250_p2)   ;;  %v828_v16 = vld [vmem:[%s1015_s5 + $0x8] sm:$0xff] (!%p250_p2)   ;;  %v829_v19 = vld [vmem:[%s1015_s5 + $0x10] sm:$0xff] (!%p250_p2)   ;;  %vm623_vm5 = vcmask (!%p250_p2), 64512  }
   0x8   : > { %759 = vmatpush3.bf16.msra.mxu1 (!%p250_p2), %v414_v3  ;;  %745 = vmatpush3.bf16.msra.mxu0 (!%p250_p2), %v343_v4  ;;  %v830_v24 = vld [vmem:[%s1015_s5 + $0x18] sm:$0xff] (!%p250_p2)   ;;  %v831_v27 = vld [vmem:[%s1015_s5 + $0x20] sm:$0xff] (!%p250_p2)   ;;  %v832_v28 = vld [vmem:[%s1015_s5 + $0x28] sm:$0xff] (!%p250_p2)  }
   0x9   : > { %p287_p3 = scmp.lt.s32.totalorder (!%p250_p2), %s286_s30, 11  ;;  %800 = vmatprep.subr.bf16.mxu1 (!%p250_p2), %v843_v0  ;;  %772 = vmatprep.subr.bf16.mxu0 (!%p250_p2), %v843_v0  ;;  %v833_v29 = vld [vmem:[%s1015_s5 + $0x30] sm:$0xff] (!%p250_p2)   ;;  %v834_v30 = vld [vmem:[%s1015_s5 + $0x38] sm:$0xff] (!%p250_p2)   ;;  %v713_v33 = vld [vmem:[%s1014_s4] ss:$0 sm:$0xff] (!%p250_p2) }
   0xd   : > { %s1019_s30 = smov (!%p287_p3, %s286_s30), 11 }
   0xe   : > { %s907_s8 = sshll.u32 %s1019_s30, 3 }
   0xf   : > { %s913_s11 = scalar_lea.vmem %s1011_s1, %s907_s8  ;;  %s919_s14 = scalar_lea.vmem %s1010_s0, %s907_s8 }
  0x10   : > { %v314_v5 = vld [vmem:[%s913_s11] sm:$0xff]  ;;  %v315_v6 = vld [vmem:[%s913_s11 + $0x8] sm:$0xff]  ;;  %v316_v12 = vld [vmem:[%s913_s11 + $0x10] sm:$0xff]  ;;  %s302_s16 = scalar_lea.vmem %s1017_s7, %s907_s8 }
  0x11   : > { %v305_v7 = vld [vmem:[%s919_s14] sm:$0xff]  ;;  %v320_v8 = vpack.c.bf16 %v315_v6, %v314_v5  ;;  %v306_v9 = vld [vmem:[%s919_s14 + $0x8] sm:$0xff]  ;;  %v317_v13 = vld [vmem:[%s913_s11 + $0x18] sm:$0xff] }
  0x12   : > { %v311_v11 = vpack.c.bf16 %v306_v9, %v305_v7  ;;  %v307_v14 = vld [vmem:[%s919_s14 + $0x10] sm:$0xff]  ;;  %v308_v15 = vld [vmem:[%s919_s14 + $0x18] sm:$0xff]  ;;  %v321_v17 = vpack.c.bf16 %v317_v13, %v316_v12  ;;  %v318_v20 = vld [vmem:[%s913_s11 + $0x20] sm:$0xff] }
  0x13   : > { %747 = vmatmul.mubr.msk.bf16.vlgmr.msra.gmra.mrb[0].mxu0 %vm331_vm3, %v320_v8  ;;  %v312_v18 = vpack.c.bf16 %v308_v15, %v307_v14  ;;  %v319_v21 = vld [vmem:[%s913_s11 + $0x28] sm:$0xff]  ;;  %v309_v22 = vld [vmem:[%s919_s14 + $0x20] sm:$0xff] }
  0x14   : > { %761 = vmatmul.mubr.msk.bf16.vlgmr.msra.gmra.mrb[0].mxu1 %vm402_vm4, %v311_v11  ;;  %750 = vmatprep.mubr.msk.bf16.mxu0 %vm844_vm2, %v843_v0  ;;  %v310_v23 = vld [vmem:[%s919_s14 + $0x28] sm:$0xff]  ;;  %v322_v25 = vpack.c.bf16 %v319_v21, %v318_v20  ;;  %v714_v14 = vld [vmem:[%s1016_s6] ss:$0 sm:$0xff] }
  0x15   : > { %764 = vmatprep.mubr.msk.bf16.mxu1 %vm844_vm2, %v843_v0  ;;  %773 = vmatpush3.bf16.msra.mxu0 %v827_v10  ;;  %v313_v26 = vpack.c.bf16 %v310_v23, %v309_v22 }
  0x16   : > { %774 = vmatprep.subr.bf16.mxu0 %v843_v0  ;;  %808 = vmatpush3.bf16.msra.mxu1 %v827_v10 }
  0x17   : > { %801 = vmatprep.subr.bf16.mxu1 %v843_v0 }
  0x19   : > { %775 = vmatpush3.bf16.msra.mxu0 %v828_v16 }
  0x1a   : > { %776 = vmatprep.subr.bf16.mxu0 %v843_v0  ;;  %809 = vmatpush3.bf16.msra.mxu1 %v828_v16 }
  0x1b   : > { %751 = vmatmul.mubr.msk.bf16.gmra.mrb[4].mxu0 %vm331_vm3, %v321_v17  ;;  %802 = vmatprep.subr.bf16.mxu1 %v843_v0 }
  0x1c   : > { %765 = vmatmul.mubr.msk.bf16.gmra.mrb[4].mxu1 %vm402_vm4, %v312_v18  ;;  %754 = vmatprep.mubr.msk.bf16.mxu0 %vm844_vm2, %v843_v0 }
  0x1d   : > { %768 = vmatprep.mubr.msk.bf16.mxu1 %vm844_vm2, %v843_v0  ;;  %777 = vmatpush3.bf16.msra.mxu0 %v829_v19 }
  0x1e   : > { %778 = vmatprep.subr.bf16.mxu0 %v843_v0  ;;  %810 = vmatpush3.bf16.msra.mxu1 %v829_v19 }
  0x1f   : > { %803 = vmatprep.subr.bf16.mxu1 %v843_v0 }
  0x21   : > { %779 = vmatpush3.bf16.msra.mxu0 %v830_v24 }
  0x22   : > { %780 = vmatprep.subr.bf16.mxu0 %v843_v0  ;;  %811 = vmatpush3.bf16.msra.mxu1 %v830_v24 }
  0x23   : > { %755 = vmatmul.mubr.msk.bf16.gmra.mrb[8].mxu0 %vm331_vm3, %v322_v25  ;;  %804 = vmatprep.subr.bf16.mxu1 %v843_v0 }
  0x24   : > { %769 = vmatmul.mubr.msk.bf16.gmra.mrb[8].mxu1 %vm402_vm4, %v313_v26  ;;  %788 = vmatprep.mubr.msk.bf16.mxu0 %vm844_vm2, %v843_v0 }
  0x25   : > { %781 = vmatpush3.bf16.msra.mxu0 %v831_v27  ;;  %792 = vmatprep.mubr.msk.bf16.mxu1 %vm844_vm2, %v843_v0 }
  0x26   : > { %782 = vmatprep.subr.bf16.mxu0 %v843_v0  ;;  %812 = vmatpush3.bf16.msra.mxu1 %v831_v27 }
  0x27   : > { %805 = vmatprep.subr.bf16.mxu1 %v843_v0 }
  0x29   : > { %783 = vmatpush3.bf16.msra.mxu0 %v832_v28 }
  0x2a   : > { %813 = vmatpush3.bf16.msra.mxu1 %v832_v28  ;;  %784 = vmatprep.subr.bf16.mxu0 %v843_v0 }
  0x2b   : > { %806 = vmatprep.subr.bf16.mxu1 %v843_v0 }
  0x2d   : > { %785 = vmatpush3.bf16.msra.mxu0 %v833_v29 }
  0x2e   : > { %814 = vmatpush3.bf16.msra.mxu1 %v833_v29  ;;  %786 = vmatprep.subr.bf16.mxu0 %v843_v0 }
  0x2f   : > { %807 = vmatprep.subr.bf16.mxu1 %v843_v0 }
  0x31   : > { %787 = vmatpush3.bf16.msra.mxu0 %v834_v30 }
  0x32   : > { %815 = vmatpush3.bf16.msra.mxu1 %v834_v30 }
  0xe6   : > { %v379_v31 = vpop.f32.mrb[0].mxu0 }
  0xe7   : > { %v450_v32 = vpop.f32.mrb[0].mxu1  ;;  %v748_v34 = vpop.f32.mrb[1].mxu0 }
  0xe8   : > { %v451_v35 = vadd.f32 %v450_v32, %v379_v31  ;;  %v762_v36 = vpop.f32.mrb[1].mxu1  ;;  %v382_v37 = vpop.f32.mrb[2].mxu0 }
  0xe9   : > { %v453_v38 = vpop.f32.mrb[2].mxu1  ;;  %v749_v39 = vpop.f32.mrb[3].mxu0 }
  0xea   : > { %v480_v40 = vadd.f32 %v713_v33, %v451_v35  ;;  %v454_v41 = vadd.f32 %v453_v38, %v382_v37  ;;  %v763_v42 = vpop.f32.mrb[3].mxu1 }
  0xec   : > { %v481_v43 = vadd.f32 %v713_v33, %v454_v41  ;;  %v486_v44 = vmax.f32 %v480_v40, 0.0 }
  0xee   : > { %v487_v45 = vmax.f32 %v481_v43, 0.0  ;;  %v387_v46 = vpop.f32.mrb[4].mxu0 }
  0xef   : > { %v458_v47 = vpop.f32.mrb[4].mxu1  ;;  %v752_v48 = vpop.f32.mrb[5].mxu0 }
  0xf0   : > { %v492_v49 = vpack.c.bf16 %v487_v45, %v486_v44  ;;  %v459_v50 = vadd.f32 %v458_v47, %v387_v46  ;;  %v766_v51 = vpop.f32.mrb[5].mxu1  ;;  %v390_v52 = vpop.f32.mrb[6].mxu0 }
  0xf1   : > { %v461_v53 = vpop.f32.mrb[6].mxu1  ;;  %v753_v54 = vpop.f32.mrb[7].mxu0 }
  0xf2   : > { %v482_v55 = vadd.f32 %v713_v33, %v459_v50  ;;  %v462_v56 = vadd.f32 %v461_v53, %v390_v52  ;;  %v767_v57 = vpop.f32.mrb[7].mxu1  ;;  %789 = vmatmul.mubr.bf16.vlgmr.msra.gmra.mrb[12].mxu0 %v492_v49 }
  0xf4   : > { %v483_v58 = vadd.f32 %v713_v33, %v462_v56  ;;  %v488_v59 = vmax.f32 %v482_v55, 0.0 }
  0xf6   : > { %v489_v60 = vmax.f32 %v483_v58, 0.0  ;;  %v395_v61 = vpop.f32.mrb[8].mxu0 }
  0xf7   : > { %v466_v62 = vpop.f32.mrb[8].mxu1  ;;  %v756_v63 = vpop.f32.mrb[9].mxu0 }
  0xf8   : > { %v493_v1 = vpack.c.bf16 %v489_v60, %v488_v59  ;;  %v467_v2 = vadd.f32 %v466_v62, %v395_v61  ;;  %v770_v3 = vpop.f32.mrb[9].mxu1  ;;  %v398_v4 = vpop.f32.mrb[10].mxu0 }
  0xf9   : > { %v469_v5 = vpop.f32.mrb[10].mxu1  ;;  %v757_v6 = vpop.f32.mrb[11].mxu0 }
  0xfa   : > { %v484_v7 = vadd.f32 %v713_v33, %v467_v2  ;;  %v470_v8 = vadd.f32 %v469_v5, %v398_v4  ;;  %v771_v9 = vpop.f32.mrb[11].mxu1  ;;  %793 = vmatmul.mubr.bf16.vlgmr.msra.gmra.mrb[12].mxu1 %v493_v1 }
  0xfb   : > { %796 = vmatprep.mubr.msk.bf16.mxu1 %vm844_vm2, %v843_v0 }
  0xfc   : > { %v485_v10 = vadd.f32 %v713_v33, %v470_v8  ;;  %v490_v11 = vmax.f32 %v484_v7, 0.0 }
  0xfe   : > { %v491_v12 = vmax.f32 %v485_v10, 0.0 }
 0x100   : > { %v494_v13 = vpack.c.bf16 %v491_v12, %v490_v11 }
 0x102   : > { %797 = vmatmul.mubr.bf16.gmra.mrb[16].mxu1 %v494_v13 }
 0x1c5   : > { %v600_v15 = vpop.f32.mrb[12].mxu0 }
 0x1c6   : > { %v601_v16 = vadd.f32 %v714_v14, %v600_v15  ;;  %v790_v17 = vpop.f32.mrb[13].mxu0 }
 0x1c7   : > { %v603_v18 = vpop.f32.mrb[14].mxu0 }
 0x1c8   : > { %624 = vst.msk [vmem:[%s302_s16] sm:$0xff] %vm623_vm5, %v601_v16  ;;  %v604_v0 = vadd.f32 %v714_v14, %v603_v18  ;;  %v791_v19 = vpop.f32.mrb[15].mxu0 }
 0x1ca   : > { %625 = vst.msk [vmem:[%s302_s16 + $0x8] sm:$0xff] %vm623_vm5, %v604_v0 }
 0x1cd   : > { %v608_v20 = vpop.f32.mrb[12].mxu1 }
 0x1ce   : > { %v609_v21 = vadd.f32 %v714_v14, %v608_v20  ;;  %v794_v22 = vpop.f32.mrb[13].mxu1 }
 0x1cf   : > { %v611_v23 = vpop.f32.mrb[14].mxu1 }
 0x1d0   : > { %626 = vst.msk [vmem:[%s302_s16 + $0x10] sm:$0xff] %vm623_vm5, %v609_v21  ;;  %v612_v24 = vadd.f32 %v714_v14, %v611_v23  ;;  %v795_v25 = vpop.f32.mrb[15].mxu1 }
 0x1d2   : > { %627 = vst.msk [vmem:[%s302_s16 + $0x18] sm:$0xff] %vm623_vm5, %v612_v24 }
 0x1d5   : > { %v616_v26 = vpop.f32.mrb[16].mxu1 }
 0x1d6   : > { %v617_v27 = vadd.f32 %v714_v14, %v616_v26  ;;  %v798_v28 = vpop.f32.mrb[17].mxu1 }
 0x1d7   : > { %v619_v29 = vpop.f32.mrb[18].mxu1 }
 0x1d8   : > { %628 = vst.msk [vmem:[%s302_s16 + $0x20] sm:$0xff] %vm623_vm5, %v617_v27  ;;  %v620_v30 = vadd.f32 %v714_v14, %v619_v29  ;;  %v799_v31 = vpop.f32.mrb[19].mxu1 }
 0x1da   : > { %629 = vst.msk [vmem:[%s302_s16 + $0x28] sm:$0xff] %vm623_vm5, %v620_v30 }
 0x1db PF: > { %s17_s24 = sadd.s32 1, %s841_s24  }
 0x1dc   : > { %p14_p4 = scmp.ge.s32.totalorder %s17_s24, 4  }
 0x1de   :  { %16 = sbr.rel (!%p14_p4) target bundleno = 1 (0x1), region = 81 }

</bundles_post_ra>
